<compile_context>
chip_gen: v7x
topology: tpu7x:2x2x1
jax: 0.10.0
libtpu: 0.0.40
codegen_flags: <defaults>
</compile_context>

<pallas_src>
import functools

import jax
import jax.numpy as jnp
from jax.experimental import pallas as pl
from jax.experimental.pallas import tpu as pltpu

_MiB = 1024 * 1024


def _round_up(x, m):
    return ((x + m - 1) // m) * m


def _cdiv(a, b):
    return -(-a // b)


def _vmem_budget():
    """(physical per-core VMEM, soft planning budget) in bytes."""
    try:
        cap = int(pltpu.get_tpu_info().vmem_capacity_bytes)
    except Exception:
        cap = 64 * _MiB  # conservative (v7x per-TC)
    # Leave ~8 MiB headroom for compiler scratch/semaphores; never plan for
    # more than ~100 MiB even on 128 MiB parts.
    return cap, min(cap - 8 * _MiB, 100 * _MiB)


# ---------------------------------------------------------------------------
# Kernels
# ---------------------------------------------------------------------------
def mlp_kernel_resident(x_ref, w1_ref, b1_ref, w2_ref, b2_ref, o_ref, *, compute_dtype):
    """Weights fully VMEM-resident: one-shot fused MLP, no scratch."""
    h = jnp.dot(x_ref[...], w1_ref[...], preferred_element_type=jnp.float32)
    h = jnp.maximum(h + b1_ref[...], 0.0)
    y = jnp.dot(h.astype(compute_dtype), w2_ref[...], preferred_element_type=jnp.float32)
    o_ref[...] = (y + b2_ref[...]).astype(o_ref.dtype)


def mlp_kernel_stream_accout(x_ref, w1_ref, b1_ref, w2_ref, b2_ref, o_ref, *, compute_dtype):
    """Hidden-dim streaming, f32 output: accumulate directly into o_ref."""
    k = pl.program_id(1)
    h = jnp.dot(x_ref[...], w1_ref[...], preferred_element_type=jnp.float32)
    h = jnp.maximum(h + b1_ref[...], 0.0)
    y = jnp.dot(h.astype(compute_dtype), w2_ref[...], preferred_element_type=jnp.float32)

    @pl.when(k == 0)
    def _first():
        o_ref[...] = y + b2_ref[...]

    @pl.when(k != 0)
    def _rest():
        o_ref[...] += y


def mlp_kernel_stream_scratch(x_ref, w1_ref, b1_ref, w2_ref, b2_ref, o_ref, acc_ref, *,
                              compute_dtype):
    """Hidden-dim streaming, non-f32 output: f32 VMEM accumulator."""
    k = pl.program_id(1)

    @pl.when(k == 0)
    def _init():
        acc_ref[...] = jnp.zeros_like(acc_ref)

    h = jnp.dot(x_ref[...], w1_ref[...], preferred_element_type=jnp.float32)
    h = jnp.maximum(h + b1_ref[...], 0.0)
    acc_ref[...] += jnp.dot(h.astype(compute_dtype), w2_ref[...],
                            preferred_element_type=jnp.float32)

    @pl.when(k == pl.num_programs(1) - 1)
    def _finalize():
        o_ref[...] = (acc_ref[...] + b2_ref[...]).astype(o_ref.dtype)


# ---------------------------------------------------------------------------
# Tile planning
# ---------------------------------------------------------------------------
def _plan_tiles(B, in_p, hid0, out_p, *, cbytes, out_bytes, row_mult, budget,
                block_rows=None, block_hidden=None, acc_in_out=True):
    """Returns (block_rows, block_hidden, n_row_tiles, n_hid_tiles, vmem_est)."""
    b_cap = _round_up(B, row_mult)

    def rows_near(target):
        # Near-divisor of B (sublane aligned) so batch padding stays < nr*row_mult.
        target = max(row_mult, min(_round_up(target, row_mult), b_cap))
        nr = _cdiv(B, target)
        return _round_up(_cdiv(B, nr), row_mult)

    def resident_bytes(br):
        w = (in_p * hid0 + hid0 * out_p) * cbytes + (hid0 + out_p) * 4  # single-buffered
        return (w
                + 2 * br * in_p * cbytes          # x tile (double buffered)
                + 2 * br * out_p * out_bytes      # out tile (double buffered)
                + br * hid0 * (4 + cbytes))       # f32 hidden intermediate + cast

    def stream_bytes(br, bh):
        acc = 0 if acc_in_out else br * out_p * 4
        return (2 * br * in_p * cbytes
                + 2 * in_p * bh * cbytes
                + 2 * bh * out_p * cbytes
                + 2 * bh * 4 + out_p * 4
                + 2 * br * out_p * out_bytes
                + br * bh * (4 + cbytes)
                + acc)

    user_rows = None if block_rows is None else rows_near(block_rows)
    user_hid = None
    if block_hidden is not None:
        user_hid = max(128, min(_round_up(block_hidden, 128), hid0))

    # 1) Prefer fully-resident weights (nk == 1): turns the kernel MXU-bound
    #    regardless of batch tiling and avoids per-core weight re-streaming.
    if user_hid is None or user_hid >= hid0:
        targets = [user_rows] if user_rows is not None else [512, 384, 256, 128, 64, 32, 16, 8]
        for t in targets:
            if t < row_mult:
                continue
            br = rows_near(t)
            est = resident_bytes(br)
            if est <= budget:
                return br, hid0, _cdiv(B, br), 1, est

    # 2) Stream the hidden dimension.  Arithmetic intensity ~ block_rows in the
    #    weight-streaming regime, so maximise block_rows first (large rows on
    #    v5e/v6e's 128 MiB; v7x's smaller budget naturally limits it), then use
    #    the largest 128-aligned near-divisor hidden tile that fits.
    row_targets = [user_rows] if user_rows is not None else [1024, 768, 512, 384, 256, 128, 64, 32, 16, 8]
    max_nk = max(2, hid0 // 128)
    for t in row_targets:
        if t < row_mult:
            continue
        br = rows_near(t)
        if user_hid is not None:
            bh = user_hid
            est = stream_bytes(br, bh)
            if est <= budget or user_rows is not None:
                return br, bh, _cdiv(B, br), _cdiv(hid0, bh), est
            continue
        for nk in range(2, max_nk + 1):
            bh = _round_up(_cdiv(hid0, nk), 128)
            est = stream_bytes(br, bh)
            if est <= budget:
                return br, bh, _cdiv(B, br), nk, est

    # 3) Fallback: smallest tiles; vmem_limit will be raised toward the estimate.
    br = rows_near(row_mult)
    bh = user_hid if user_hid is not None else 128
    return br, bh, _cdiv(B, br), _cdiv(hid0, bh), stream_bytes(br, bh)


# ---------------------------------------------------------------------------
# Wrapper
# ---------------------------------------------------------------------------
def make_mlp_forward(w1, b1, w2, b2, *, compute_dtype=jnp.bfloat16, out_dtype=None,
                     block_rows=None, block_hidden=None):
    """Builds a fused-MLP forward.  Weights: w1 [in, H], w2 [H, out] (transposed
    relative to torch.nn.Linear storage).  Padding/casting of the weights is
    done once here, not per forward call."""
    in_size, hidden = w1.shape
    hidden2, out_size = w2.shape
    assert hidden2 == hidden and b1.shape == (hidden,) and b2.shape == (out_size,)

    cbytes = jnp.dtype(compute_dtype).itemsize
    row_mult = {4: 8, 2: 16, 1: 32}[cbytes]

    in_p = _round_up(in_size, 128)
    hid0 = _round_up(hidden, 128)
    out_p = _round_up(out_size, 128)

    # Hoisted (one-time) weight padding + casting; padded rows/cols are zero so
    # the math is unchanged.
    w1p0 = jnp.pad(w1, ((0, in_p - in_size), (0, hid0 - hidden))).astype(compute_dtype)
    w2p0 = jnp.pad(w2, ((0, hid0 - hidden), (0, out_p - out_size))).astype(compute_dtype)
    b1p0 = jnp.pad(b1, (0, hid0 - hidden)).astype(jnp.float32).reshape(1, hid0)
    b2p = jnp.pad(b2, (0, out_p - out_size)).astype(jnp.float32).reshape(1, out_p)

    phys_vmem, budget = _vmem_budget()

    def forward(x):
        B = x.shape[0]
        odt = jnp.dtype(x.dtype if out_dtype is None else out_dtype)
        out_bytes = odt.itemsize
        acc_in_out = odt == jnp.dtype(jnp.float32)

        br, bh, nr, nk, vmem_est = _plan_tiles(
            B, in_p, hid0, out_p, cbytes=cbytes, out_bytes=out_bytes,
            row_mult=row_mult, budget=budget, block_rows=block_rows,
            block_hidden=block_hidden, acc_in_out=acc_in_out)
        hid_p = bh * nk
        B_p = br * nr

        xp = jnp.pad(x, ((0, B_p - B), (0, in_p - in_size))).astype(compute_dtype)
        if hid_p == hid0:
            w1p, w2p, b1p = w1p0, w2p0, b1p0
        else:
            # Only in the streaming regime with a non-divisor hidden tile; the
            # extra pad is < 128*nk columns.
            w1p = jnp.pad(w1p0, ((0, 0), (0, hid_p - hid0)))
            w2p = jnp.pad(w2p0, ((0, hid_p - hid0), (0, 0)))
            b1p = jnp.pad(b1p0, ((0, 0), (0, hid_p - hid0)))

        if nk == 1:
            grid = (nr,)
            in_specs = [
                pl.BlockSpec((br, in_p), lambda i: (i, 0)),
                pl.BlockSpec((in_p, hid_p), lambda i: (0, 0), pipeline_mode=pl.Buffered(1)),
                pl.BlockSpec((1, hid_p), lambda i: (0, 0), pipeline_mode=pl.Buffered(1)),
                pl.BlockSpec((hid_p, out_p), lambda i: (0, 0), pipeline_mode=pl.Buffered(1)),
                pl.BlockSpec((1, out_p), lambda i: (0, 0), pipeline_mode=pl.Buffered(1)),
            ]
            out_specs = pl.BlockSpec((br, out_p), lambda i: (i, 0))
            scratch = []
            kernel = functools.partial(mlp_kernel_resident, compute_dtype=compute_dtype)
            semantics = ("parallel",)
        else:
            grid = (nr, nk)
            in_specs = [
                pl.BlockSpec((br, in_p), lambda i, k: (i, 0)),
                pl.BlockSpec((in_p, bh), lambda i, k: (0, k)),
                pl.BlockSpec((1, bh), lambda i, k: (0, k)),
                pl.BlockSpec((bh, out_p), lambda i, k: (k, 0)),
                pl.BlockSpec((1, out_p), lambda i, k: (0, 0), pipeline_mode=pl.Buffered(1)),
            ]
            out_specs = pl.BlockSpec((br, out_p), lambda i, k: (i, 0))
            if acc_in_out:
                scratch = []
                kernel = functools.partial(mlp_kernel_stream_accout, compute_dtype=compute_dtype)
            else:
                scratch = [pltpu.VMEM((br, out_p), jnp.float32)]
                kernel = functools.partial(mlp_kernel_stream_scratch, compute_dtype=compute_dtype)
            semantics = ("parallel", "arbitrary")

        # vmem limit: never request the whole physical VMEM (leave ~4 MiB for
        # compiler internals); never clamp below the actual estimate.
        vmem_limit = int(min(phys_vmem - 4 * _MiB, max(32 * _MiB, int(1.25 * vmem_est))))

        w_passes = 1 if nk == 1 else nr
        cost = pl.CostEstimate(
            flops=2 * B_p * hid_p * (in_p + out_p),
            transcendentals=0,
            bytes_accessed=int(xp.size * cbytes
                               + w_passes * (w1p.size + w2p.size) * cbytes
                               + w_passes * b1p.size * 4 + b2p.size * 4
                               + B_p * out_p * out_bytes),
        )

        out_padded = pl.pallas_call(
            kernel,
            out_shape=jax.ShapeDtypeStruct((B_p, out_p), odt),
            grid_spec=pltpu.PrefetchScalarGridSpec(
                num_scalar_prefetch=0,
                grid=grid,
                in_specs=in_specs,
                out_specs=out_specs,
                scratch_shapes=scratch,
            ),
            compiler_params=pltpu.CompilerParams(
                dimension_semantics=semantics,
                vmem_limit_bytes=vmem_limit,
            ),
            cost_estimate=cost,
        )(xp, w1p, b1p, w2p, b2p)

        return out_padded[:B, :out_size]

    return forward


def mlp_forward(x, w1, b1, w2, b2, **kwargs):
    """Convenience one-shot wrapper (prefer make_mlp_forward for repeated calls
    so weight padding/casting is hoisted out of the hot path)."""
    return make_mlp_forward(w1, b1, w2, b2, **kwargs)(x)


def reference_mlp(x, w1, b1, w2, b2):
    h = jnp.maximum(x @ w1 + b1, 0.0)
    return h @ w2 + b2


if __name__ == "__main__":
    # Small shapes consistent with the module (Lorenz-96 style MLP).
    batch, in_size, mlp_size, out_size = 8, 16, 32, 8

    key = jax.random.PRNGKey(0)
    kx, kw1, kb1, kw2, kb2 = jax.random.split(key, 5)

    bound1 = 1.0 / (in_size ** 0.5)
    bound2 = 1.0 / (mlp_size ** 0.5)
    x = jax.random.normal(kx, (batch, in_size), dtype=jnp.float32)
    w1 = jax.random.uniform(kw1, (in_size, mlp_size), jnp.float32, -bound1, bound1)
    b1 = jax.random.uniform(kb1, (mlp_size,), jnp.float32, -bound1, bound1)
    w2 = jax.random.uniform(kw2, (mlp_size, out_size), jnp.float32, -bound2, bound2)
    b2 = jax.random.uniform(kb2, (out_size,), jnp.float32, -bound2, bound2)

    ref = reference_mlp(x, w1, b1, w2, b2)

    # 1) f32 compute, resident-weight path: tight tolerance.
    fwd_f32 = make_mlp_forward(w1, b1, w2, b2, compute_dtype=jnp.float32)
    out_f32 = jax.block_until_ready(fwd_f32(x))
    assert out_f32.shape == (batch, out_size)
    assert jnp.allclose(out_f32, ref, atol=1e-5, rtol=1e-5), "f32 resident mismatch"

    # 2) bf16-matmul / f32-accumulate, resident-weight path: looser tolerance.
    fwd_bf16 = make_mlp_forward(w1, b1, w2, b2)
    out_bf16 = jax.block_until_ready(fwd_bf16(x))
    assert out_bf16.shape == (batch, out_size)
    assert jnp.allclose(out_bf16, ref, atol=5e-2, rtol=5e-2), "bf16 resident mismatch"

    # 3) Exercise the hidden-streaming path (accumulate-into-output, f32 out)
    #    with a larger hidden dim and a forced 128-wide hidden tile.
    hidden3 = 384
    kw1b, kb1b, kw2b = jax.random.split(kw1, 3)
    bound1b = 1.0 / (in_size ** 0.5)
    bound2b = 1.0 / (hidden3 ** 0.5)
    w1b = jax.random.uniform(kw1b, (in_size, hidden3), jnp.float32, -bound1b, bound1b)
    b1b = jax.random.uniform(kb1b, (hidden3,), jnp.float32, -bound1b, bound1b)
    w2b = jax.random.uniform(kw2b, (hidden3, out_size), jnp.float32, -bound2b, bound2b)
    refb = reference_mlp(x, w1b, b1b, w2b, b2)

    out_stream = jax.block_until_ready(
        mlp_forward(x, w1b, b1b, w2b, b2, compute_dtype=jnp.float32, block_hidden=128))
    assert out_stream.shape == (batch, out_size)
    assert jnp.allclose(out_stream, refb, atol=1e-5, rtol=1e-5), "streaming mismatch"

    # 4) Streaming path with a non-f32 output (scratch accumulator, bf16 writeback).
    out_stream_bf16 = jax.block_until_ready(
        mlp_forward(x, w1b, b1b, w2b, b2, block_hidden=128, out_dtype=jnp.bfloat16))
    assert out_stream_bf16.shape == (batch, out_size)
    assert jnp.allclose(out_stream_bf16.astype(jnp.float32), refb, atol=5e-2, rtol=5e-2), \
        "streaming bf16 mismatch"

    print("KERNEL_OK")
</pallas_src>

<mosaic_0001>
module attributes {stable_mosaic.version = 11 : i64} {
  func.func @mlp_kernel_resident(%arg0: i32, %arg1: memref<8x128xf32, #tpu.memory_space<vmem>>, %arg2: memref<128x128xf32, #tpu.memory_space<vmem>>, %arg3: memref<1x128xf32, #tpu.memory_space<vmem>>, %arg4: memref<128x128xf32, #tpu.memory_space<vmem>>, %arg5: memref<1x128xf32, #tpu.memory_space<vmem>>, %arg6: memref<8x128xf32, #tpu.memory_space<vmem>>) attributes {dimension_semantics = [#tpu.dimension_semantics<parallel>], iteration_bounds = array<i64: 1>, scalar_prefetch = 0 : i64, scratch_operands = 0 : i64, tpu.core_type = #tpu.core_type<tc>, window_params = [{transform_indices = @transform_0, window_bounds = array<i64: 8, 128>}, {pipeline_mode = #tpu.pipeline_mode<synchronous>, transform_indices = @transform_1, window_bounds = array<i64: 128, 128>}, {pipeline_mode = #tpu.pipeline_mode<synchronous>, transform_indices = @transform_2, window_bounds = array<i64: 1, 128>}, {pipeline_mode = #tpu.pipeline_mode<synchronous>, transform_indices = @transform_3, window_bounds = array<i64: 128, 128>}, {pipeline_mode = #tpu.pipeline_mode<synchronous>, transform_indices = @transform_4, window_bounds = array<i64: 1, 128>}, {transform_indices = @transform_5, window_bounds = array<i64: 8, 128>}]} {
    %c0 = arith.constant 0 : index
    %c0_0 = arith.constant 0 : index
    %0 = vector.load %arg1[%c0, %c0_0] : memref<8x128xf32, #tpu.memory_space<vmem>>, vector<8x128xf32>
    %c0_1 = arith.constant 0 : index
    %c0_2 = arith.constant 0 : index
    %1 = vector.load %arg2[%c0_1, %c0_2] : memref<128x128xf32, #tpu.memory_space<vmem>>, vector<128x128xf32>
    %cst = arith.constant dense<0.000000e+00> : vector<8x128xf32>
    %2 = tpu.matmul %0, %1, %cst {dimension_numbers = #tpu.dot_dimension_numbers<[1], [0], [0], [1], [0, 0, 1, 1], [], []>} : vector<8x128xf32>, vector<128x128xf32>, vector<8x128xf32> -> vector<8x128xf32>
    %c0_3 = arith.constant 0 : index
    %c0_4 = arith.constant 0 : index
    %3 = vector.load %arg3[%c0_3, %c0_4] : memref<1x128xf32, #tpu.memory_space<vmem>>, vector<1x128xf32>
    %4 = vector.broadcast %3 : vector<1x128xf32> to vector<8x128xf32>
    %5 = arith.addf %2, %4 : vector<8x128xf32>
    %cst_5 = arith.constant 0.000000e+00 : f32
    %6 = vector.broadcast %cst_5 : f32 to vector<8x128xf32>
    %7 = arith.maximumf %5, %6 : vector<8x128xf32>
    %c0_6 = arith.constant 0 : index
    %c0_7 = arith.constant 0 : index
    %8 = vector.load %arg4[%c0_6, %c0_7] : memref<128x128xf32, #tpu.memory_space<vmem>>, vector<128x128xf32>
    %cst_8 = arith.constant dense<0.000000e+00> : vector<8x128xf32>
    %9 = tpu.matmul %7, %8, %cst_8 {dimension_numbers = #tpu.dot_dimension_numbers<[1], [0], [0], [1], [0, 0, 1, 1], [], []>} : vector<8x128xf32>, vector<128x128xf32>, vector<8x128xf32> -> vector<8x128xf32>
    %c0_9 = arith.constant 0 : index
    %c0_10 = arith.constant 0 : index
    %10 = vector.load %arg5[%c0_9, %c0_10] : memref<1x128xf32, #tpu.memory_space<vmem>>, vector<1x128xf32>
    %11 = vector.broadcast %10 : vector<1x128xf32> to vector<8x128xf32>
    %12 = arith.addf %9, %11 : vector<8x128xf32>
    %c0_11 = arith.constant 0 : index
    %c0_12 = arith.constant 0 : index
    %13 = vector.load %arg6[%c0_11, %c0_12] : memref<8x128xf32, #tpu.memory_space<vmem>>, vector<8x128xf32>
    tpu.vector_store %arg6[%c0_11, %c0_12], %12 {strides = array<i32>} : memref<8x128xf32, #tpu.memory_space<vmem>>, vector<8x128xf32>,
    return
  }
  func.func @transform_0(%arg0: i32) -> (i32, i32) {
    %c0_i32 = arith.constant 0 : i32
    %c0_i32_0 = arith.constant 0 : i32
    return %arg0, %c0_i32 : i32, i32
  }
  func.func @transform_1(%arg0: i32) -> (i32, i32) {
    %c0_i32 = arith.constant 0 : i32
    %c0_i32_0 = arith.constant 0 : i32
    %c0_i32_1 = arith.constant 0 : i32
    return %c0_i32, %c0_i32_0 : i32, i32
  }
  func.func @transform_2(%arg0: i32) -> (i32, i32) {
    %c0_i32 = arith.constant 0 : i32
    %c0_i32_0 = arith.constant 0 : i32
    %c0_i32_1 = arith.constant 0 : i32
    return %c0_i32, %c0_i32_0 : i32, i32
  }
  func.func @transform_3(%arg0: i32) -> (i32, i32) {
    %c0_i32 = arith.constant 0 : i32
    %c0_i32_0 = arith.constant 0 : i32
    %c0_i32_1 = arith.constant 0 : i32
    return %c0_i32, %c0_i32_0 : i32, i32
  }
  func.func @transform_4(%arg0: i32) -> (i32, i32) {
    %c0_i32 = arith.constant 0 : i32
    %c0_i32_0 = arith.constant 0 : i32
    %c0_i32_1 = arith.constant 0 : i32
    return %c0_i32, %c0_i32_0 : i32, i32
  }
  func.func @transform_5(%arg0: i32) -> (i32, i32) {
    %c0_i32 = arith.constant 0 : i32
    %c0_i32_0 = arith.constant 0 : i32
    return %arg0, %c0_i32 : i32, i32
  }
}

</mosaic_0001>

<bundles_post_ra>
// kernel: tpu_custom_call.1
= control target key start
LH: loop header
LB: loop body
LE: loop exit
PB: predicated region body
PF: predicated region fallthrough
CT: control target
= control target key end

     0   :  { %10 = vsyncpa [#allocation3], 0  ;;  %s637_s0 = inlined_call_operand.hbm [shape: f32[8,128], index: 0, kind: input, shape index: {}]   ;;  %s638_s1 = inlined_call_operand.hbm [shape: f32[128,128], index: 1, kind: input, shape index: {}]   ;;  %s639_s2 = inlined_call_operand.vmem [shape: f32[1,128], index: 2, kind: input, shape index: {}]   ;;  %s640_s3 = inlined_call_operand.hbm [shape: f32[128,128], index: 3, kind: input, shape index: {}]   ;;  %s641_s4 = inlined_call_operand.vmem [shape: f32[1,128], index: 4, kind: input, shape index: {}]   ;;  %s642_s5 = inlined_call_operand.hbm [shape: f32[8,128], index: 5, kind: output, shape index: {}]  }
   0x1   :  { %11 = vsyncpa [#allocation6], 0 }
   0x2   :  { %12 = vsyncpa [#allocation4], 0  ;;  %s522_s18 = smov [#allocation5]   ;;  %s428_s22 = scalar_lea.hbm %s638_s1, 2048 }
   0x3   :  { %s28_s19 = sshll.u32 %s522_s18, 4  ;;  %p429_p0 = scmp.ne.s32.totalorder %s638_s1, %s428_s22  ;;  %s29_s19 = int_to_ptr.vmem [resolvable:$true] %s28_s19 }
   0x4   :  { %p432_p1 = scmp.lt.u32.totalorder %s428_s22, %s638_s1 }
   0x6   :  { %p434_p2 = pnand %p432_p1, %p429_p0 }
   0x8   :  { %437 = shalt.err (!%p434_p2)
}
   0x9   :  { %s438_s27 = scalar_lea.vmem %s29_s19, 2048  ;;  %p443_p4 = scmp.lt.s32.totalorder %s29_s19, %s29_s19 }
   0xa   :  { %p439_p3 = scmp.ne.s32.totalorder %s29_s19, %s438_s27  ;;  %p444_p5 = scmp.lt.s32.totalorder %s438_s27, %s438_s27 }
   0xc   :  { %p445_p6 = por %p444_p5, %p443_p4 }
   0xe   :  { %p446_p7 = pnand %p445_p6, %p439_p3 }
  0x10   :  { %449 = shalt.err (!%p446_p7)
}
  0x11   :  { %s523_s28 = smov 128   ;;  %s524_s29 = smov 8  }
  0x12   :  { %34 = dma.hbm_to_vmem [thread:$0]  %s638_s1, 2048, %s29_s19, [#allocation6], %s523_s28, %s523_s28, %s524_s29  }
  0x13   :  { %s525_s7 = smov [#allocation2]   ;;  %s526_s9 = smov [#allocation7]  }
  0x14   :  { %s19_s8 = sshll.u32 %s525_s7, 4  ;;  %s42_s10 = sshll.u32 %s526_s9, 4  ;;  %s20_s8 = int_to_ptr.vmem [resolvable:$true] %s19_s8  ;;  %s43_s10 = int_to_ptr.vmem [resolvable:$true] %s42_s10 }
  0x15   :  { %s450_s13 = scalar_lea.hbm %s637_s0, 128 }
  0x16   :  { %p451_p8 = scmp.ne.s32.totalorder %s637_s0, %s450_s13  ;;  %p454_p9 = scmp.lt.u32.totalorder %s450_s13, %s637_s0 }
  0x18   :  { %p456_p10 = pnand %p454_p9, %p451_p8 }
  0x1a   :  { %459 = shalt.err (!%p456_p10)
}
  0x1b   :  { %s460_s1 = scalar_lea.vmem %s20_s8, 128  ;;  %p465_p12 = scmp.lt.s32.totalorder %s20_s8, %s20_s8 }
  0x1c   :  { %p461_p11 = scmp.ne.s32.totalorder %s20_s8, %s460_s1  ;;  %p466_p13 = scmp.lt.s32.totalorder %s460_s1, %s460_s1 }
  0x1e   :  { %p467_p0 = por %p466_p13, %p465_p12 }
  0x20   :  { %p468_p1 = pnand %p467_p0, %p461_p11 }
  0x22   :  { %471 = shalt.err (!%p468_p1)
}
  0x23   :  { %22 = dma.hbm_to_vmem [thread:$0]  %s637_s0, 128, %s20_s8, [#allocation3]  }
  0x24   :  { %s472_s22 = scalar_lea.hbm %s640_s3, 2048 }
  0x25   :  { %p473_p2 = scmp.ne.s32.totalorder %s640_s3, %s472_s22  ;;  %p476_p3 = scmp.lt.u32.totalorder %s472_s22, %s640_s3 }
  0x27   :  { %p478_p4 = pnand %p476_p3, %p473_p2 }
  0x29   :  { %481 = shalt.err (!%p478_p4)
}
  0x2a   :  { %s482_s27 = scalar_lea.vmem %s43_s10, 2048  ;;  %p487_p6 = scmp.lt.s32.totalorder %s43_s10, %s43_s10 }
  0x2b   :  { %p483_p5 = scmp.ne.s32.totalorder %s43_s10, %s482_s27  ;;  %p488_p7 = scmp.lt.s32.totalorder %s482_s27, %s482_s27 }
  0x2d   :  { %p489_p8 = por %p488_p7, %p487_p6 }
  0x2f   :  { %p490_p9 = pnand %p489_p8, %p483_p5 }
  0x31   :  { %493 = shalt.err (!%p490_p9)
}
  0x32   :  { %48 = dma.hbm_to_vmem [thread:$0]  %s640_s3, 2048, %s43_s10, [#allocation6], %s523_s28, %s523_s28, %s524_s29  }
  0x33   :  { %516 = dma.done.wait [#allocation3], 128  }
  0x34   :  { %517 = vsyncadd [#allocation3], 4294967168 }
  0x35   :  { %518 = dma.done.wait [#allocation6], 4096  }
  0x36   :  { %519 = vsyncadd [#allocation6], 4294963200  ;;  %v527_v0 = vmov 0.0|0.0   ;;  %vm528_vm0 = vmmov 0   ;;  %v529_v1 = vmov 0.0   ;;  %v61_v2 = vld [vmem:[#allocation5] sm:$0xff] }
  0x37   :  { %371 = vmatprep.subr.bf16.mxu0 %v527_v0  ;;  %333 = vmatprep.mubr.msk.f32.mxu0 %vm528_vm0, %v529_v1  ;;  %v62_v3 = vld [vmem:[#allocation5 + $0x8] sm:$0xff]  ;;  %v63_v4 = vld [vmem:[#allocation5 + $0x10] sm:$0xff]  ;;  %v64_v6 = vld [vmem:[#allocation5 + $0x18] sm:$0xff]  ;;  %s530_s7 = smov [#allocation8]  }
  0x38   :  { %395 = vmatprep.subr.bf16.mxu1 %v527_v0  ;;  %368 = vmatprep.mubr.msk.f32.mxu1 %vm528_vm0, %v529_v1  ;;  %v372_v5 = vpack.c.bf16 %v62_v3, %v61_v2  ;;  %v375_v7 = vpack.c.bf16 %v64_v6, %v63_v4  ;;  %v65_v8 = vld [vmem:[#allocation5 + $0x20] sm:$0xff]  ;;  %v66_v9 = vld [vmem:[#allocation5 + $0x28] sm:$0xff]  ;;  %v157_v12 = vld [vmem:[#allocation7 + $0x10] sm:$0xff]  ;;  %s255_s8 = sshll.u32 %s530_s7, 4  ;;  %s256_s8 = int_to_ptr.vmem [resolvable:$true] %s255_s8 }
  0x39   :  { %v155_v10 = vld [vmem:[#allocation7] sm:$0xff]  ;;  %v156_v11 = vld [vmem:[#allocation7 + $0x8] sm:$0xff]  ;;  %v158_v13 = vld [vmem:[#allocation7 + $0x18] sm:$0xff]  ;;  %v378_v14 = vpack.c.bf16 %v66_v9, %v65_v8  ;;  %s494_s9 = scalar_lea.vmem %s256_s8, 128  ;;  %p499_p11 = scmp.lt.s32.totalorder %s256_s8, %s256_s8 }
  0x3a   :  { %373 = vmatpush3.bf16.msra.mxu0 %v372_v5  ;;  %v396_v15 = vpack.c.bf16 %v156_v11, %v155_v10  ;;  %v67_v16 = vld [vmem:[#allocation5 + $0x30] sm:$0xff]  ;;  %v68_v17 = vld [vmem:[#allocation5 + $0x38] sm:$0xff]  ;;  %v399_v18 = vpack.c.bf16 %v158_v13, %v157_v12  ;;  %v159_v19 = vld [vmem:[#allocation7 + $0x20] sm:$0xff]  ;;  %p495_p10 = scmp.ne.s32.totalorder %s256_s8, %s494_s9  ;;  %p500_p12 = scmp.lt.s32.totalorder %s494_s9, %s494_s9 }
  0x3b   :  { %374 = vmatprep.subr.bf16.mxu0 %v527_v0  ;;  %v160_v20 = vld [vmem:[#allocation7 + $0x28] sm:$0xff]  ;;  %v381_v21 = vpack.c.bf16 %v68_v17, %v67_v16  ;;  %v69_v22 = vld [vmem:[#allocation5 + $0x40] sm:$0xff]  ;;  %v161_v25 = vld [vmem:[#allocation7 + $0x30] sm:$0xff] }
  0x3c   :  { %397 = vmatpush3.bf16.msra.mxu1 %v396_v15  ;;  %v70_v23 = vld [vmem:[#allocation5 + $0x48] sm:$0xff]  ;;  %v402_v24 = vpack.c.bf16 %v160_v20, %v159_v19  ;;  %v162_v26 = vld [vmem:[#allocation7 + $0x38] sm:$0xff]  ;;  %v71_v28 = vld [vmem:[#allocation5 + $0x50] sm:$0xff]  ;;  %p501_p13 = por %p500_p12, %p499_p11 }
  0x3d   :  { %398 = vmatprep.subr.bf16.mxu1 %v527_v0  ;;  %v384_v27 = vpack.c.bf16 %v70_v23, %v69_v22  ;;  %v72_v29 = vld [vmem:[#allocation5 + $0x58] sm:$0xff]  ;;  %v405_v30 = vpack.c.bf16 %v162_v26, %v161_v25  ;;  %v163_v31 = vld [vmem:[#allocation7 + $0x40] sm:$0xff]  ;;  %v164_v32 = vld [vmem:[#allocation7 + $0x48] sm:$0xff] }
  0x3e   :  { %376 = vmatpush3.bf16.msra.mxu0 %v375_v7  ;;  %v387_v33 = vpack.c.bf16 %v72_v29, %v71_v28  ;;  %v73_v34 = vld [vmem:[#allocation5 + $0x60] sm:$0xff]  ;;  %v74_v35 = vld [vmem:[#allocation5 + $0x68] sm:$0xff]  ;;  %v408_v36 = vpack.c.bf16 %v164_v32, %v163_v31  ;;  %v165_v37 = vld [vmem:[#allocation7 + $0x50] sm:$0xff]  ;;  %p502_p0 = pnand %p501_p13, %p495_p10 }
  0x3f   :  { %377 = vmatprep.subr.bf16.mxu0 %v527_v0  ;;  %v166_v38 = vld [vmem:[#allocation7 + $0x58] sm:$0xff]  ;;  %v390_v39 = vpack.c.bf16 %v74_v35, %v73_v34  ;;  %v75_v40 = vld [vmem:[#allocation5 + $0x70] sm:$0xff]  ;;  %v167_v43 = vld [vmem:[#allocation7 + $0x60] sm:$0xff] }
  0x40   :  { %400 = vmatpush3.bf16.msra.mxu1 %v399_v18  ;;  %v76_v41 = vld [vmem:[#allocation5 + $0x78] sm:$0xff]  ;;  %v411_v42 = vpack.c.bf16 %v166_v38, %v165_v37  ;;  %v168_v44 = vld [vmem:[#allocation7 + $0x68] sm:$0xff]  ;;  %v169_v48 = vld [vmem:[#allocation7 + $0x70] sm:$0xff] }
  0x41   :  { %401 = vmatprep.subr.bf16.mxu1 %v527_v0  ;;  %v393_v45 = vpack.c.bf16 %v76_v41, %v75_v40  ;;  %v414_v46 = vpack.c.bf16 %v168_v44, %v167_v43  ;;  %v60_v47 = vld [vmem:[#allocation2] sm:$0xff] }
  0x42   :  { %379 = vmatpush3.bf16.msra.mxu0 %v378_v14  ;;  %v170_v49 = vld [vmem:[#allocation7 + $0x78] sm:$0xff] }
  0x43   :  { %380 = vmatprep.subr.bf16.mxu0 %v527_v0  ;;  %v417_v50 = vpack.c.bf16 %v170_v49, %v169_v48  ;;  %v265_v51 = vld [vmem:[%s639_s2] ss:$0 sm:$0xff] }
  0x44   :  { %403 = vmatpush3.bf16.msra.mxu1 %v402_v24  ;;  %v266_v56 = vld [vmem:[%s641_s4] ss:$0 sm:$0xff] }
  0x45   :  { %404 = vmatprep.subr.bf16.mxu1 %v527_v0 }
  0x46   :  { %382 = vmatpush3.bf16.msra.mxu0 %v381_v21 }
  0x47   :  { %383 = vmatprep.subr.bf16.mxu0 %v527_v0 }
  0x48   :  { %406 = vmatpush3.bf16.msra.mxu1 %v405_v30 }
  0x49   :  { %407 = vmatprep.subr.bf16.mxu1 %v527_v0 }
  0x4a   :  { %385 = vmatpush3.bf16.msra.mxu0 %v384_v27 }
  0x4b   :  { %386 = vmatprep.subr.bf16.mxu0 %v527_v0 }
  0x4c   :  { %409 = vmatpush3.bf16.msra.mxu1 %v408_v36 }
  0x4d   :  { %410 = vmatprep.subr.bf16.mxu1 %v527_v0 }
  0x4e   :  { %388 = vmatpush3.bf16.msra.mxu0 %v387_v33 }
  0x4f   :  { %389 = vmatprep.subr.bf16.mxu0 %v527_v0 }
  0x50   :  { %412 = vmatpush3.bf16.msra.mxu1 %v411_v42 }
  0x51   :  { %413 = vmatprep.subr.bf16.mxu1 %v527_v0 }
  0x52   :  { %391 = vmatpush3.bf16.msra.mxu0 %v390_v39 }
  0x53   :  { %392 = vmatprep.subr.bf16.mxu0 %v527_v0 }
  0x54   :  { %415 = vmatpush3.bf16.msra.mxu1 %v414_v46 }
  0x55   :  { %416 = vmatprep.subr.bf16.mxu1 %v527_v0 }
  0x56   :  { %394 = vmatpush3.bf16.msra.mxu0 %v393_v45 }
  0x58   :  { %418 = vmatpush3.bf16.msra.mxu1 %v417_v50 }
  0x59   :  { %334 = vmatmul.mubr.f32.vlgmr.msra.gmra.mrb[0].mxu0 %v60_v47 }
 0x12c   :  { %v150_v52 = vpop.f32.mrb[0].mxu0 }
 0x12d   :  { %v151_v53 = vadd.f32 %v265_v51, %v150_v52  ;;  %v335_v54 = vpop.f32.mrb[1].mxu0 }
 0x12f   :  { %v154_v55 = vmax.f32 %v151_v53, 0.0 }
 0x131   :  { %369 = vmatmul.mubr.f32.vlgmr.msra.gmra.mrb[0].mxu1 %v154_v55 }
 0x204   :  { %v244_v57 = vpop.f32.mrb[0].mxu1 }
 0x205   :  { %v245_v58 = vadd.f32 %v266_v56, %v244_v57  ;;  %v370_v59 = vpop.f32.mrb[1].mxu1 }
 0x207   :  { %248 = vst [vmem:[#allocation8] sm:$0xff] %v245_v58 }
 0x208   :  { %505 = shalt.err (!%p502_p0)
}
 0x209   :  { %s506_s11 = scalar_lea.hbm %s642_s5, 128 }
 0x20a   :  { %p507_p1 = scmp.ne.s32.totalorder %s642_s5, %s506_s11  ;;  %p510_p2 = scmp.lt.u32.totalorder %s506_s11, %s642_s5 }
 0x20c   :  { %p512_p3 = pnand %p510_p2, %p507_p1 }
 0x20e   :  { %515 = shalt.err (!%p512_p3)
}
 0x20f   :  { %258 = dma.vmem_to_hbm [thread:$0]  %s256_s8, 128, %s642_s5, [#allocation4]  }
 0x210   :  { %520 = dma.done.wait [#allocation4], 128  }
 0x211   :  { %521 = vsyncadd [#allocation4], 4294967168 }
 0x212   :  { %262 = vsyncpa [#allocation3], 1 }
 0x213   :  { %263 = vsyncpa [#allocation6], 1 }
 0x214   :  { %264 = vsyncpa [#allocation4], 1 }

</bundles_post_ra>
